<compile_context>
chip_gen: v7x
topology: tpu7x:2x2x1
jax: 0.10.0
libtpu: 0.0.40
codegen_flags: <defaults>
</compile_context>

<pallas_src>
import jax
import jax.numpy as jnp
from jax.experimental import pallas as pl
from jax.experimental.pallas import tpu as pltpu


def _round_up(x, m):
    return ((x + m - 1) // m) * m


def sac_actor_kernel(x_ref, w1_ref, b1_ref, w2_ref, b2_ref, w3_ref, b3_ref, o_ref):
    """Fused 3-layer MLP + ReLU + tanh on one batch tile (weights VMEM-resident)."""
    x = x_ref[...]  # f32 [TM, state_dim]

    # Layer 1: Linear(state_dim, 256) + ReLU   (bf16 x bf16 -> f32 accumulate)
    h1 = jnp.dot(x.astype(jnp.bfloat16), w1_ref[...],
                 preferred_element_type=jnp.float32) + b1_ref[...]
    h1 = jnp.maximum(h1, 0.0)

    # Layer 2: Linear(256, 256) + ReLU
    h2 = jnp.dot(h1.astype(jnp.bfloat16), w2_ref[...],
                 preferred_element_type=jnp.float32) + b2_ref[...]
    h2 = jnp.maximum(h2, 0.0)

    # Layer 3 ("means" half, lane-padded to 128): Linear(256, OUT_PAD) + tanh
    out = jnp.dot(h2.astype(jnp.bfloat16), w3_ref[...],
                  preferred_element_type=jnp.float32) + b3_ref[...]
    o_ref[...] = jnp.tanh(out)  # dense full-lane store; tanh runs on the EUP


def sac_actor_forward(states, params):
    """states: [B, state_dim] f32 -> tanh(means): [B, action_dim] f32."""
    w1, b1, w2, b2, w3, b3 = params
    B, state_dim = states.shape
    action_dim = w3.shape[1] // 2

    # --- Pre-slice layer 3 to the means half and pad to a lane-dense width ----
    out_pad = _round_up(max(action_dim, 128), 128)
    w3p = jnp.zeros((w3.shape[0], out_pad), w3.dtype).at[:, :action_dim].set(
        w3[:, :action_dim])
    b3p = jnp.zeros((1, out_pad), b3.dtype).at[:, :action_dim].set(
        b3[:, :action_dim])

    # --- bf16 weight streaming (f32 biases) -----------------------------------
    w1b = w1.astype(jnp.bfloat16)
    w2b = w2.astype(jnp.bfloat16)
    w3b = w3p.astype(jnp.bfloat16)

    # --- Batch tiling: TM rows per grid step, weights resident across grid ----
    TM = 256 if B >= 256 else _round_up(max(B, 8), 8)
    Bp = _round_up(B, TM)
    x = states if Bp == B else jnp.pad(states, ((0, Bp - B), (0, 0)))

    out = pl.pallas_call(
        sac_actor_kernel,
        out_shape=jax.ShapeDtypeStruct((Bp, out_pad), jnp.float32),
        grid=(Bp // TM,),
        in_specs=[
            pl.BlockSpec((TM, state_dim), lambda i: (i, 0)),   # batch-tiled input
            pl.BlockSpec(w1b.shape, lambda i: (0, 0)),         # VMEM-resident weights
            pl.BlockSpec(b1.shape, lambda i: (0, 0)),
            pl.BlockSpec(w2b.shape, lambda i: (0, 0)),
            pl.BlockSpec(b2.shape, lambda i: (0, 0)),
            pl.BlockSpec(w3b.shape, lambda i: (0, 0)),
            pl.BlockSpec(b3p.shape, lambda i: (0, 0)),
        ],
        out_specs=pl.BlockSpec((TM, out_pad), lambda i: (i, 0)),
        compiler_params=pltpu.CompilerParams(
            dimension_semantics=("parallel",),   # batch axis -> both TCs on v7x
        ),
    )(x, w1b, b1, w2b, b2, w3b, b3p)

    return out[:B, :action_dim]


def init_params(key, state_dim, action_dim, hidden=256):
    """Deterministic init mimicking nn.Linear's default uniform(-1/sqrt(fan_in), +...)."""
    ks = jax.random.split(key, 6)

    def lin(kw, kb, fan_in, fan_out):
        bound = 1.0 / jnp.sqrt(jnp.float32(fan_in))
        w = jax.random.uniform(kw, (fan_in, fan_out), jnp.float32, -bound, bound)
        b = jax.random.uniform(kb, (1, fan_out), jnp.float32, -bound, bound)
        return w, b

    w1, b1 = lin(ks[0], ks[1], state_dim, hidden)
    w2, b2 = lin(ks[2], ks[3], hidden, hidden)
    w3, b3 = lin(ks[4], ks[5], hidden, 2 * action_dim)
    return (w1, b1, w2, b2, w3, b3)


def reference_forward_bf16(states, params):
    """Pure-JAX reference with the same bf16-weight / f32-accumulate recipe."""
    w1, b1, w2, b2, w3, b3 = params
    action_dim = w3.shape[1] // 2
    h1 = jnp.maximum(jnp.dot(states.astype(jnp.bfloat16), w1.astype(jnp.bfloat16),
                             preferred_element_type=jnp.float32) + b1, 0.0)
    h2 = jnp.maximum(jnp.dot(h1.astype(jnp.bfloat16), w2.astype(jnp.bfloat16),
                             preferred_element_type=jnp.float32) + b2, 0.0)
    out = jnp.dot(h2.astype(jnp.bfloat16), w3.astype(jnp.bfloat16),
                  preferred_element_type=jnp.float32) + b3
    return jnp.tanh(out[:, :action_dim])


def reference_forward_f32(states, params):
    """Pure-f32 reference of the PyTorch forward (semantics check, loose tol)."""
    w1, b1, w2, b2, w3, b3 = params
    h1 = jnp.maximum(states @ w1 + b1, 0.0)
    h2 = jnp.maximum(h1 @ w2 + b2, 0.0)
    out = h2 @ w3 + b3
    means, _ = jnp.split(out, 2, axis=-1)
    return jnp.tanh(means)


if __name__ == "__main__":
    # Small shapes consistent with the module: state_shape = (16,), action_shape = 8
    B = 2
    STATE_DIM = 16
    ACTION_DIM = 8

    key = jax.random.PRNGKey(0)
    k_params, k_x = jax.random.split(key)

    params = init_params(k_params, STATE_DIM, ACTION_DIM)
    states = jax.random.normal(k_x, (B, STATE_DIM), jnp.float32)

    out = sac_actor_forward(states, params)
    out = jax.block_until_ready(out)
    assert out.shape == (B, ACTION_DIM)

    # Exact-recipe reference (bf16 weights, f32 accumulation): tight tolerance.
    ref_bf16 = reference_forward_bf16(states, params)
    assert jnp.allclose(out, ref_bf16, atol=1e-3, rtol=1e-3), \
        "mismatch vs. bf16-weight reference"

    # Full-f32 PyTorch-semantics reference: loose tolerance (bf16 weight rounding).
    ref_f32 = reference_forward_f32(states, params)
    assert jnp.allclose(out, ref_f32, atol=3e-2, rtol=3e-2), \
        "mismatch vs. f32 reference"

    print("KERNEL_OK")
</pallas_src>

<mosaic_0001>
module attributes {stable_mosaic.version = 11 : i64} {
  func.func @sac_actor_kernel(%arg0: i32, %arg1: memref<8x16xf32, #tpu.memory_space<vmem>>, %arg2: memref<16x256xbf16, #tpu.memory_space<vmem>>, %arg3: memref<1x256xf32, #tpu.memory_space<vmem>>, %arg4: memref<256x256xbf16, #tpu.memory_space<vmem>>, %arg5: memref<1x256xf32, #tpu.memory_space<vmem>>, %arg6: memref<256x128xbf16, #tpu.memory_space<vmem>>, %arg7: memref<1x128xf32, #tpu.memory_space<vmem>>, %arg8: memref<8x128xf32, #tpu.memory_space<vmem>>) attributes {dimension_semantics = [#tpu.dimension_semantics<parallel>], iteration_bounds = array<i64: 1>, scalar_prefetch = 0 : i64, scratch_operands = 0 : i64, tpu.core_type = #tpu.core_type<tc>, window_params = [{transform_indices = @transform_0, window_bounds = array<i64: 8, 16>}, {pipeline_mode = #tpu.pipeline_mode<synchronous>, transform_indices = @transform_1, window_bounds = array<i64: 16, 256>}, {pipeline_mode = #tpu.pipeline_mode<synchronous>, transform_indices = @transform_2, window_bounds = array<i64: 1, 256>}, {pipeline_mode = #tpu.pipeline_mode<synchronous>, transform_indices = @transform_3, window_bounds = array<i64: 256, 256>}, {pipeline_mode = #tpu.pipeline_mode<synchronous>, transform_indices = @transform_4, window_bounds = array<i64: 1, 256>}, {pipeline_mode = #tpu.pipeline_mode<synchronous>, transform_indices = @transform_5, window_bounds = array<i64: 256, 128>}, {pipeline_mode = #tpu.pipeline_mode<synchronous>, transform_indices = @transform_6, window_bounds = array<i64: 1, 128>}, {transform_indices = @transform_7, window_bounds = array<i64: 8, 128>}]} {
    %c0 = arith.constant 0 : index
    %c0_0 = arith.constant 0 : index
    %0 = vector.load %arg1[%c0, %c0_0] : memref<8x16xf32, #tpu.memory_space<vmem>>, vector<8x16xf32>
    %1 = arith.truncf %0 : vector<8x16xf32> to vector<8x16xbf16>
    %c0_1 = arith.constant 0 : index
    %c0_2 = arith.constant 0 : index
    %2 = vector.load %arg2[%c0_1, %c0_2] : memref<16x256xbf16, #tpu.memory_space<vmem>>, vector<16x256xbf16>
    %cst = arith.constant dense<0.000000e+00> : vector<8x256xf32>
    %3 = tpu.matmul %1, %2, %cst {dimension_numbers = #tpu.dot_dimension_numbers<[1], [0], [0], [1], [0, 0, 1, 1], [], []>} : vector<8x16xbf16>, vector<16x256xbf16>, vector<8x256xf32> -> vector<8x256xf32>
    %c0_3 = arith.constant 0 : index
    %c0_4 = arith.constant 0 : index
    %4 = vector.load %arg3[%c0_3, %c0_4] : memref<1x256xf32, #tpu.memory_space<vmem>>, vector<1x256xf32>
    %5 = vector.broadcast %4 : vector<1x256xf32> to vector<8x256xf32>
    %6 = arith.addf %3, %5 : vector<8x256xf32>
    %cst_5 = arith.constant 0.000000e+00 : f32
    %7 = vector.broadcast %cst_5 : f32 to vector<8x256xf32>
    %8 = arith.maximumf %6, %7 : vector<8x256xf32>
    %9 = arith.truncf %8 : vector<8x256xf32> to vector<8x256xbf16>
    %c0_6 = arith.constant 0 : index
    %c0_7 = arith.constant 0 : index
    %10 = vector.load %arg4[%c0_6, %c0_7] : memref<256x256xbf16, #tpu.memory_space<vmem>>, vector<256x256xbf16>
    %cst_8 = arith.constant dense<0.000000e+00> : vector<8x256xf32>
    %11 = tpu.matmul %9, %10, %cst_8 {dimension_numbers = #tpu.dot_dimension_numbers<[1], [0], [0], [1], [0, 0, 1, 1], [], []>} : vector<8x256xbf16>, vector<256x256xbf16>, vector<8x256xf32> -> vector<8x256xf32>
    %c0_9 = arith.constant 0 : index
    %c0_10 = arith.constant 0 : index
    %12 = vector.load %arg5[%c0_9, %c0_10] : memref<1x256xf32, #tpu.memory_space<vmem>>, vector<1x256xf32>
    %13 = vector.broadcast %12 : vector<1x256xf32> to vector<8x256xf32>
    %14 = arith.addf %11, %13 : vector<8x256xf32>
    %cst_11 = arith.constant 0.000000e+00 : f32
    %15 = vector.broadcast %cst_11 : f32 to vector<8x256xf32>
    %16 = arith.maximumf %14, %15 : vector<8x256xf32>
    %17 = arith.truncf %16 : vector<8x256xf32> to vector<8x256xbf16>
    %c0_12 = arith.constant 0 : index
    %c0_13 = arith.constant 0 : index
    %18 = vector.load %arg6[%c0_12, %c0_13] : memref<256x128xbf16, #tpu.memory_space<vmem>>, vector<256x128xbf16>
    %cst_14 = arith.constant dense<0.000000e+00> : vector<8x128xf32>
    %19 = tpu.matmul %17, %18, %cst_14 {dimension_numbers = #tpu.dot_dimension_numbers<[1], [0], [0], [1], [0, 0, 1, 1], [], []>} : vector<8x256xbf16>, vector<256x128xbf16>, vector<8x128xf32> -> vector<8x128xf32>
    %c0_15 = arith.constant 0 : index
    %c0_16 = arith.constant 0 : index
    %20 = vector.load %arg7[%c0_15, %c0_16] : memref<1x128xf32, #tpu.memory_space<vmem>>, vector<1x128xf32>
    %21 = vector.broadcast %20 : vector<1x128xf32> to vector<8x128xf32>
    %22 = arith.addf %19, %21 : vector<8x128xf32>
    %23 = math.tanh %22 : vector<8x128xf32>
    %c0_17 = arith.constant 0 : index
    %c0_18 = arith.constant 0 : index
    %24 = vector.load %arg8[%c0_17, %c0_18] : memref<8x128xf32, #tpu.memory_space<vmem>>, vector<8x128xf32>
    tpu.vector_store %arg8[%c0_17, %c0_18], %23 {strides = array<i32>} : memref<8x128xf32, #tpu.memory_space<vmem>>, vector<8x128xf32>,
    return
  }
  func.func @transform_0(%arg0: i32) -> (i32, i32) {
    %c0_i32 = arith.constant 0 : i32
    %c0_i32_0 = arith.constant 0 : i32
    return %arg0, %c0_i32 : i32, i32
  }
  func.func @transform_1(%arg0: i32) -> (i32, i32) {
    %c0_i32 = arith.constant 0 : i32
    %c0_i32_0 = arith.constant 0 : i32
    %c0_i32_1 = arith.constant 0 : i32
    return %c0_i32, %c0_i32_0 : i32, i32
  }
  func.func @transform_2(%arg0: i32) -> (i32, i32) {
    %c0_i32 = arith.constant 0 : i32
    %c0_i32_0 = arith.constant 0 : i32
    %c0_i32_1 = arith.constant 0 : i32
    return %c0_i32, %c0_i32_0 : i32, i32
  }
  func.func @transform_3(%arg0: i32) -> (i32, i32) {
    %c0_i32 = arith.constant 0 : i32
    %c0_i32_0 = arith.constant 0 : i32
    %c0_i32_1 = arith.constant 0 : i32
    return %c0_i32, %c0_i32_0 : i32, i32
  }
  func.func @transform_4(%arg0: i32) -> (i32, i32) {
    %c0_i32 = arith.constant 0 : i32
    %c0_i32_0 = arith.constant 0 : i32
    %c0_i32_1 = arith.constant 0 : i32
    return %c0_i32, %c0_i32_0 : i32, i32
  }
  func.func @transform_5(%arg0: i32) -> (i32, i32) {
    %c0_i32 = arith.constant 0 : i32
    %c0_i32_0 = arith.constant 0 : i32
    %c0_i32_1 = arith.constant 0 : i32
    return %c0_i32, %c0_i32_0 : i32, i32
  }
  func.func @transform_6(%arg0: i32) -> (i32, i32) {
    %c0_i32 = arith.constant 0 : i32
    %c0_i32_0 = arith.constant 0 : i32
    %c0_i32_1 = arith.constant 0 : i32
    return %c0_i32, %c0_i32_0 : i32, i32
  }
  func.func @transform_7(%arg0: i32) -> (i32, i32) {
    %c0_i32 = arith.constant 0 : i32
    %c0_i32_0 = arith.constant 0 : i32
    return %arg0, %c0_i32 : i32, i32
  }
}

</mosaic_0001>

<bundles_post_ra>
// kernel: tpu_custom_call.1
= control target key start
LH: loop header
LB: loop body
LE: loop exit
PB: predicated region body
PF: predicated region fallthrough
CT: control target
= control target key end

     0   :  { %12 = vsyncpa [#allocation3], 0  ;;  %s995_s0 = inlined_call_operand.hbm [shape: f32[8,16], index: 0, kind: input, shape index: {}]   ;;  %s996_s1 = inlined_call_operand.hbm [shape: bf16[16,256], index: 1, kind: input, shape index: {}]   ;;  %s997_s2 = inlined_call_operand.vmem [shape: f32[1,256], index: 2, kind: input, shape index: {}]   ;;  %s998_s3 = inlined_call_operand.hbm [shape: bf16[256,256], index: 3, kind: input, shape index: {}]   ;;  %s999_s4 = inlined_call_operand.vmem [shape: f32[1,256], index: 4, kind: input, shape index: {}]   ;;  %s1000_s5 = inlined_call_operand.hbm [shape: bf16[256,128], index: 5, kind: input, shape index: {}]   ;;  %s1001_s6 = inlined_call_operand.vmem [shape: f32[1,128], index: 6, kind: input, shape index: {}]   ;;  %s1002_s7 = inlined_call_operand.hbm [shape: f32[8,128], index: 7, kind: output, shape index: {}]  }
   0x1   :  { %13 = vsyncpa [#allocation6], 0 }
   0x2   :  { %14 = vsyncpa [#allocation9], 0 }
   0x3   :  { %15 = vsyncpa [#allocation4], 0  ;;  %s870_s24 = smov [#allocation5]   ;;  %s752_s28 = scalar_lea.hbm %s996_s1, 256 }
   0x4   :  { %s31_s25 = sshll.u32 %s870_s24, 4  ;;  %p753_p0 = scmp.ne.s32.totalorder %s996_s1, %s752_s28  ;;  %s32_s25 = int_to_ptr.vmem [resolvable:$true] %s31_s25 }
   0x5   :  { %p756_p1 = scmp.lt.u32.totalorder %s752_s28, %s996_s1 }
   0x7   :  { %p758_p2 = pnand %p756_p1, %p753_p0 }
   0x9   :  { %761 = shalt.err (!%p758_p2)
}
   0xa   :  { %s762_s10 = scalar_lea.vmem %s32_s25, 256  ;;  %p767_p4 = scmp.lt.s32.totalorder %s32_s25, %s32_s25 }
   0xb   :  { %p763_p3 = scmp.ne.s32.totalorder %s32_s25, %s762_s10  ;;  %p768_p5 = scmp.lt.s32.totalorder %s762_s10, %s762_s10 }
   0xd   :  { %p769_p6 = por %p768_p5, %p767_p4 }
   0xf   :  { %p770_p7 = pnand %p769_p6, %p763_p3 }
  0x11   :  { %773 = shalt.err (!%p770_p7)
}
  0x12   :  { %s871_s11 = smov 128   ;;  %s872_s12 = smov 8  }
  0x13   :  { %37 = dma.hbm_to_vmem [thread:$0]  %s996_s1, 256, %s32_s25, [#allocation6], %s871_s11, %s871_s11, %s872_s12  }
  0x14   :  { %s873_s15 = smov [#allocation2]   ;;  %s874_s17 = smov [#allocation7]  }
  0x15   :  { %s22_s16 = sshll.u32 %s873_s15, 4  ;;  %s45_s18 = sshll.u32 %s874_s17, 4  ;;  %s23_s16 = int_to_ptr.vmem [resolvable:$true] %s22_s16  ;;  %s46_s18 = int_to_ptr.vmem [resolvable:$true] %s45_s18 }
  0x16   :  { %s774_s21 = scalar_lea.hbm %s995_s0, 128 }
  0x17   :  { %p775_p8 = scmp.ne.s32.totalorder %s995_s0, %s774_s21  ;;  %p778_p9 = scmp.lt.u32.totalorder %s774_s21, %s995_s0 }
  0x19   :  { %p780_p10 = pnand %p778_p9, %p775_p8 }
  0x1b   :  { %783 = shalt.err (!%p780_p10)
}
  0x1c   :  { %s784_s1 = scalar_lea.vmem %s23_s16, 128  ;;  %p789_p12 = scmp.lt.s32.totalorder %s23_s16, %s23_s16 }
  0x1d   :  { %p785_p11 = scmp.ne.s32.totalorder %s23_s16, %s784_s1  ;;  %p790_p13 = scmp.lt.s32.totalorder %s784_s1, %s784_s1 }
  0x1f   :  { %p791_p0 = por %p790_p13, %p789_p12 }
  0x21   :  { %p792_p1 = pnand %p791_p0, %p785_p11 }
  0x23   :  { %795 = shalt.err (!%p792_p1)
}
  0x24   :  { %25 = dma.hbm_to_vmem [thread:$0]  %s995_s0, 128, %s23_s16, [#allocation3]  }
  0x25   :  { %s796_s30 = scalar_lea.hbm %s998_s3, 4096 }
  0x26   :  { %p797_p2 = scmp.ne.s32.totalorder %s998_s3, %s796_s30  ;;  %p800_p3 = scmp.lt.u32.totalorder %s796_s30, %s998_s3 }
  0x28   :  { %p802_p4 = pnand %p800_p3, %p797_p2 }
  0x2a   :  { %805 = shalt.err (!%p802_p4)
}
  0x2b   :  { %s806_s14 = scalar_lea.vmem %s46_s18, 4096  ;;  %p811_p6 = scmp.lt.s32.totalorder %s46_s18, %s46_s18 }
  0x2c   :  { %p807_p5 = scmp.ne.s32.totalorder %s46_s18, %s806_s14  ;;  %p812_p7 = scmp.lt.s32.totalorder %s806_s14, %s806_s14 }
  0x2e   :  { %p813_p8 = por %p812_p7, %p811_p6 }
  0x30   :  { %p814_p9 = pnand %p813_p8, %p807_p5 }
  0x32   :  { %817 = shalt.err (!%p814_p9)
}
  0x33   :  { %51 = dma.hbm_to_vmem [thread:$0]  %s998_s3, 4096, %s46_s18, [#allocation6], %s871_s11, %s871_s11, %s872_s12  }
  0x34   :  { %s875_s16 = smov [#allocation8]   ;;  %s818_s21 = scalar_lea.hbm %s1000_s5, 2048 }
  0x35   :  { %s59_s17 = sshll.u32 %s875_s16, 4  ;;  %p819_p10 = scmp.ne.s32.totalorder %s1000_s5, %s818_s21  ;;  %s60_s17 = int_to_ptr.vmem [resolvable:$true] %s59_s17 }
  0x36   :  { %p822_p11 = scmp.lt.u32.totalorder %s818_s21, %s1000_s5 }
  0x38   :  { %p824_p12 = pnand %p822_p11, %p819_p10 }
  0x3a   :  { %827 = shalt.err (!%p824_p12)
}
  0x3b   :  { %s828_s1 = scalar_lea.vmem %s60_s17, 2048  ;;  %p833_p0 = scmp.lt.s32.totalorder %s60_s17, %s60_s17 }
  0x3c   :  { %p829_p13 = scmp.ne.s32.totalorder %s60_s17, %s828_s1  ;;  %p834_p1 = scmp.lt.s32.totalorder %s828_s1, %s828_s1 }
  0x3e   :  { %p835_p2 = por %p834_p1, %p833_p0 }
  0x40   :  { %p836_p3 = pnand %p835_p2, %p829_p13 }
  0x42   :  { %839 = shalt.err (!%p836_p3)
}
  0x43   :  { %s876_s3 = smov 64   ;;  %s877_s11 = smov 4  }
  0x44   :  { %65 = dma.hbm_to_vmem [thread:$0]  %s1000_s5, 2048, %s60_s17, [#allocation9], %s876_s3, %s876_s3, %s877_s11  }
  0x45   :  { %862 = dma.done.wait [#allocation3], 128  }
  0x46   :  { %863 = vsyncadd [#allocation3], 4294967168 }
  0x47   :  { %864 = dma.done.wait [#allocation6], 4352  }
  0x48   :  { %865 = vsyncadd [#allocation6], 4294962944 }
  0x49   :  { %866 = dma.done.wait [#allocation9], 2048  }
  0x4a   :  { %867 = vsyncadd [#allocation9], 4294965248  ;;  %v878_v0 = vmov 0   ;;  %v683_v1 = vld [vmem:[#allocation5 + $0x4] ss:$8 sps:$4 sm:$0xff]   ;;  %v81_v3 = vld [vmem:[#allocation2] sm:$0xff]  ;;  %v87_v49 = vlaneseq }
  0x4b   :  { %143 = vmatprep.mubr.bf16.mxu0 %v878_v0  ;;  %v685_v2 = vld [vmem:[#allocation5] ss:$8 sps:$4 sm:$0xff]   ;;  %111 = vmatprep.subr.bf16.mxu0 %v683_v1  ;;  %v82_v4 = vpack.c.bf16 %v81_v3, %v81_v3  ;;  %v686_v5 = vld [vmem:[#allocation7 + $0x4] ss:$8 sps:$4 sm:$0xff]   ;;  %v688_v6 = vld [vmem:[#allocation7] ss:$8 sps:$4 sm:$0xff]  }
  0x4c   :  { %112 = vmatpush1.bf16.msra.mxu0 %v685_v2  ;;  %vm107_vm0 = vcmask 130048   ;;  %v689_v7 = vld [vmem:[#allocation7 + $0x14] ss:$8 sps:$4 sm:$0xff]   ;;  %360 = vmatprep.subr.bf16.mxu1 %v686_v5  ;;  %v691_v8 = vld [vmem:[#allocation7 + $0x10] ss:$8 sps:$4 sm:$0xff]   ;;  %v734_v37 = vld [vmem:[#allocation8 + $0x40] sm:$0xff]  }
  0x4d   :  { %361 = vmatpush1.bf16.msra.mxu1 %v688_v6  ;;  %v692_v9 = vld [vmem:[#allocation7 + $0x24] ss:$8 sps:$4 sm:$0xff]   ;;  %v694_v10 = vld [vmem:[#allocation7 + $0x20] ss:$8 sps:$4 sm:$0xff]   ;;  %v695_v11 = vld [vmem:[#allocation7 + $0x34] ss:$8 sps:$4 sm:$0xff]   ;;  %651 = vmatprep.subr.bf16.mxu0 %v734_v37 }
  0x4e   :  { %362 = vmatprep.subr.bf16.mxu1 %v689_v7  ;;  %v697_v12 = vld [vmem:[#allocation7 + $0x30] ss:$8 sps:$4 sm:$0xff]   ;;  %v698_v13 = vld [vmem:[#allocation7 + $0x44] ss:$8 sps:$4 sm:$0xff]   ;;  %v700_v14 = vld [vmem:[#allocation7 + $0x40] ss:$8 sps:$4 sm:$0xff]  }
  0x4f   :  { %601 = vmatmul.mubr.msk.bf16.vlgmr.msra.gmra.mrb[0].mxu0 %vm107_vm0, %v82_v4  ;;  %v701_v15 = vld [vmem:[#allocation7 + $0x54] ss:$8 sps:$4 sm:$0xff]   ;;  %v703_v16 = vld [vmem:[#allocation7 + $0x50] ss:$8 sps:$4 sm:$0xff]   ;;  %v704_v17 = vld [vmem:[#allocation7 + $0x64] ss:$8 sps:$4 sm:$0xff]  }
  0x50   :  { %v706_v18 = vld [vmem:[#allocation7 + $0x60] ss:$8 sps:$4 sm:$0xff]   ;;  %v707_v19 = vld [vmem:[#allocation7 + $0x74] ss:$8 sps:$4 sm:$0xff]   ;;  %v709_v20 = vld [vmem:[#allocation7 + $0x70] ss:$8 sps:$4 sm:$0xff]  }
  0x51   :  { %363 = vmatpush1.bf16.msra.mxu1 %v691_v8  ;;  %v710_v21 = vld [vmem:[#allocation7 + $0x84] ss:$8 sps:$4 sm:$0xff]   ;;  %v712_v22 = vld [vmem:[#allocation7 + $0x80] ss:$8 sps:$4 sm:$0xff]   ;;  %v713_v23 = vld [vmem:[#allocation7 + $0x94] ss:$8 sps:$4 sm:$0xff]  }
  0x52   :  { %364 = vmatprep.subr.bf16.mxu1 %v692_v9  ;;  %v715_v24 = vld [vmem:[#allocation7 + $0x90] ss:$8 sps:$4 sm:$0xff]   ;;  %v716_v25 = vld [vmem:[#allocation7 + $0xa4] ss:$8 sps:$4 sm:$0xff]   ;;  %v718_v26 = vld [vmem:[#allocation7 + $0xa0] ss:$8 sps:$4 sm:$0xff]  }
  0x53   :  { %v719_v27 = vld [vmem:[#allocation7 + $0xb4] ss:$8 sps:$4 sm:$0xff]   ;;  %v721_v28 = vld [vmem:[#allocation7 + $0xb0] ss:$8 sps:$4 sm:$0xff]   ;;  %v722_v29 = vld [vmem:[#allocation7 + $0xc4] ss:$8 sps:$4 sm:$0xff]  }
  0x54   :  { %v724_v30 = vld [vmem:[#allocation7 + $0xc0] ss:$8 sps:$4 sm:$0xff]   ;;  %v725_v31 = vld [vmem:[#allocation7 + $0xd4] ss:$8 sps:$4 sm:$0xff]   ;;  %v727_v32 = vld [vmem:[#allocation7 + $0xd0] ss:$8 sps:$4 sm:$0xff]  }
  0x55   :  { %365 = vmatpush1.bf16.msra.mxu1 %v694_v10  ;;  %v728_v33 = vld [vmem:[#allocation7 + $0xe4] ss:$8 sps:$4 sm:$0xff]   ;;  %v730_v34 = vld [vmem:[#allocation7 + $0xe0] ss:$8 sps:$4 sm:$0xff]   ;;  %v731_v35 = vld [vmem:[#allocation7 + $0xf4] ss:$8 sps:$4 sm:$0xff]  }
  0x56   :  { %366 = vmatprep.subr.bf16.mxu1 %v695_v11  ;;  %v733_v36 = vld [vmem:[#allocation7 + $0xf0] ss:$8 sps:$4 sm:$0xff]   ;;  %v735_v38 = vld [vmem:[#allocation8] sm:$0xff]   ;;  %v736_v39 = vld [vmem:[#allocation8 + $0x48] sm:$0xff]   ;;  %v88_v50 = vshrl.u32 %v87_v49, 7 }
  0x57   :  { %652 = vmatpush3.bf16.msra.mxu0 %v735_v38  ;;  %v737_v40 = vld [vmem:[#allocation8 + $0x8] sm:$0xff]   ;;  %v738_v41 = vld [vmem:[#allocation8 + $0x50] sm:$0xff]   ;;  %v740_v43 = vld [vmem:[#allocation8 + $0x58] sm:$0xff]  }
  0x58   :  { %653 = vmatprep.subr.bf16.mxu0 %v736_v39  ;;  %v739_v42 = vld [vmem:[#allocation8 + $0x10] sm:$0xff]   ;;  %v741_v44 = vld [vmem:[#allocation8 + $0x18] sm:$0xff]   ;;  %v742_v45 = vld [vmem:[#allocation8 + $0x60] sm:$0xff]   ;;  %v89_v51 = vsub.s32 0, %v88_v50  ;;  %v93_v53 = vsub.s32 1, %v88_v50 }
  0x59   :  { %367 = vmatpush1.bf16.msra.mxu1 %v697_v12  ;;  %v743_v46 = vld [vmem:[#allocation8 + $0x20] sm:$0xff]   ;;  %v744_v47 = vld [vmem:[#allocation8 + $0x68] sm:$0xff]   ;;  %v746_v2 = vld [vmem:[#allocation8 + $0x70] sm:$0xff]  }
  0x5a   :  { %368 = vmatprep.subr.bf16.mxu1 %v698_v13  ;;  %v745_v48 = vld [vmem:[#allocation8 + $0x28] sm:$0xff]   ;;  %v747_v3 = vld [vmem:[#allocation8 + $0x30] sm:$0xff]   ;;  %v748_v4 = vld [vmem:[#allocation8 + $0x78] sm:$0xff]  }
  0x5b   :  { %654 = vmatpush3.bf16.msra.mxu0 %v737_v40  ;;  %v85_v52 = vld [vmem:[%s997_s2] sm:$0x3]  ;;  %v749_v5 = vld [vmem:[#allocation8 + $0x38] sm:$0xff]  }
  0x5c   :  { %655 = vmatprep.subr.bf16.mxu0 %v738_v41  ;;  %v90_v54 = vrot.slane %v85_v52, %v89_v51  ;;  %v94_v55 = vrot.slane %v85_v52, %v93_v53  ;;  %v188_v6 = vld [vmem:[%s999_s4] sm:$0x3]  ;;  %s879_s4 = smov [#allocation10]  }
  0x5d   :  { %369 = vmatpush1.bf16.msra.mxu1 %v700_v14  ;;  %v193_v7 = vrot.slane %v188_v6, %v89_v51  ;;  %v197_v8 = vrot.slane %v188_v6, %v93_v53  ;;  %s588_s30 = sshll.u32 %s879_s4, 4  ;;  %s589_s30 = int_to_ptr.vmem [resolvable:$true] %s588_s30 }
  0x5e   :  { %370 = vmatprep.subr.bf16.mxu1 %v701_v15  ;;  %s840_s8 = scalar_lea.vmem %s589_s30, 128  ;;  %p845_p5 = scmp.lt.s32.totalorder %s589_s30, %s589_s30 }
  0x5f   :  { %656 = vmatpush3.bf16.msra.mxu0 %v739_v42  ;;  %p841_p4 = scmp.ne.s32.totalorder %s589_s30, %s840_s8  ;;  %p846_p6 = scmp.lt.s32.totalorder %s840_s8, %s840_s8 }
  0x60   :  { %657 = vmatprep.subr.bf16.mxu0 %v740_v43 }
  0x61   :  { %371 = vmatpush1.bf16.msra.mxu1 %v703_v16  ;;  %p847_p7 = por %p846_p6, %p845_p5 }
  0x62   :  { %372 = vmatprep.subr.bf16.mxu1 %v704_v17 }
  0x63   :  { %658 = vmatpush3.bf16.msra.mxu0 %v741_v44  ;;  %p848_p8 = pnand %p847_p7, %p841_p4 }
  0x64   :  { %659 = vmatprep.subr.bf16.mxu0 %v742_v45 }
  0x65   :  { %373 = vmatpush1.bf16.msra.mxu1 %v706_v18 }
  0x66   :  { %374 = vmatprep.subr.bf16.mxu1 %v707_v19 }
  0x67   :  { %660 = vmatpush3.bf16.msra.mxu0 %v743_v46 }
  0x68   :  { %661 = vmatprep.subr.bf16.mxu0 %v744_v47 }
  0x69   :  { %375 = vmatpush1.bf16.msra.mxu1 %v709_v20  ;;  %v634_v20 = vld [vmem:[%s1001_s6] ss:$0 sm:$0xff] }
  0x6a   :  { %376 = vmatprep.subr.bf16.mxu1 %v710_v21 }
  0x6b   :  { %662 = vmatpush3.bf16.msra.mxu0 %v745_v48 }
  0x6c   :  { %663 = vmatprep.subr.bf16.mxu0 %v746_v2 }
  0x6d   :  { %377 = vmatpush1.bf16.msra.mxu1 %v712_v22 }
  0x6e   :  { %378 = vmatprep.subr.bf16.mxu1 %v713_v23 }
  0x6f   :  { %664 = vmatpush3.bf16.msra.mxu0 %v747_v3 }
  0x70   :  { %665 = vmatprep.subr.bf16.mxu0 %v748_v4 }
  0x71   :  { %379 = vmatpush1.bf16.msra.mxu1 %v715_v24 }
  0x72   :  { %380 = vmatprep.subr.bf16.mxu1 %v716_v25 }
  0x73   :  { %666 = vmatpush3.bf16.msra.mxu0 %v749_v5 }
  0x75   :  { %381 = vmatpush1.bf16.msra.mxu1 %v718_v26 }
  0x76   :  { %382 = vmatprep.subr.bf16.mxu1 %v719_v27 }
  0x79   :  { %383 = vmatpush1.bf16.msra.mxu1 %v721_v28 }
  0x7a   :  { %384 = vmatprep.subr.bf16.mxu1 %v722_v29 }
  0x7d   :  { %385 = vmatpush1.bf16.msra.mxu1 %v724_v30 }
  0x7e   :  { %386 = vmatprep.subr.bf16.mxu1 %v725_v31 }
  0x81   :  { %387 = vmatpush1.bf16.msra.mxu1 %v727_v32 }
  0x82   :  { %388 = vmatprep.subr.bf16.mxu1 %v728_v33 }
  0x85   :  { %389 = vmatpush1.bf16.msra.mxu1 %v730_v34 }
  0x86   :  { %390 = vmatprep.subr.bf16.mxu1 %v731_v35 }
  0x89   :  { %391 = vmatpush1.bf16.msra.mxu1 %v733_v36 }
 0x122   :  { %v145_v56 = vpop.f32.mrb[0].mxu0 }
 0x123   :  { %v146_v57 = vadd.f32 %v145_v56, %v90_v54  ;;  %v147_v58 = vpop.f32.mrb[1].mxu0 }
 0x124   :  { %v148_v59 = vadd.f32 %v147_v58, %v94_v55  ;;  %v149_v60 = vpop.f32.mrb[2].mxu0 }
 0x125   :  { %v152_v61 = vmax.f32 %v146_v57, 0.0  ;;  %v150_v62 = vpop.f32.mrb[3].mxu0 }
 0x126   :  { %v153_v63 = vmax.f32 %v148_v59, 0.0 }
 0x127   :  { %v154_v1 = vpack.c.bf16 %v152_v61, %v152_v61 }
 0x128   :  { %v155_v0 = vpack.c.bf16 %v153_v63, %v153_v63 }
 0x12a   :  { %392 = vmatprep.mubr.bf16.mxu1 %v155_v0 }
 0x12b   :  { %393 = vmatmul.mubr.bf16.vlgmr.msra.gmra.mrb[0].mxu1 %v154_v1 }
 0x1fe   :  { %v394_v9 = vpop.f32.mrb[0].mxu1 }
 0x1ff   :  { %v395_v10 = vadd.f32 %v394_v9, %v193_v7  ;;  %v396_v11 = vpop.f32.mrb[1].mxu1 }
 0x200   :  { %v397_v12 = vadd.f32 %v396_v11, %v197_v8  ;;  %v398_v13 = vpop.f32.mrb[2].mxu1 }
 0x201   :  { %v401_v14 = vmax.f32 %v395_v10, 0.0  ;;  %v399_v15 = vpop.f32.mrb[3].mxu1 }
 0x202   :  { %v402_v16 = vmax.f32 %v397_v12, 0.0 }
 0x203   :  { %v403_v18 = vpack.c.bf16 %v401_v14, %v401_v14 }
 0x204   :  { %v404_v17 = vpack.c.bf16 %v402_v16, %v402_v16 }
 0x206   :  { %572 = vmatprep.mubr.bf16.mxu0 %v404_v17 }
 0x207   :  { %573 = vmatmul.mubr.bf16.vlgmr.msra.gmra.mrb[4].mxu0 %v403_v18 }
 0x2da   :  { %v667_v19 = vpop.f32.mrb[4].mxu0 }
 0x2db   :  { %v668_v21 = vpop.f32.mrb[5].mxu0 }
 0x2dc   :  { %v669_v22 = vadd.f32 %v668_v21, %v667_v19  ;;  %v670_v23 = vpop.f32.mrb[6].mxu0 }
 0x2dd   :  { %v671_v24 = vpop.f32.mrb[7].mxu0 }
 0x2de   :  { %v575_v25 = vadd.f32 %v669_v22, %v634_v20 }
 0x2e0   :  { %750 = vtanh.f32 %v575_v25 }
 0x2ea   :  { %v751_v26 = vpop.eup %750 }
 0x2eb   :  { %581 = vst [vmem:[#allocation10] sm:$0xff] %v751_v26 }
 0x2ec   :  { %851 = shalt.err (!%p848_p8)
}
 0x2ed   :  { %s852_s10 = scalar_lea.hbm %s1002_s7, 128 }
 0x2ee   :  { %p853_p9 = scmp.ne.s32.totalorder %s1002_s7, %s852_s10  ;;  %p856_p10 = scmp.lt.u32.totalorder %s852_s10, %s1002_s7 }
 0x2f0   :  { %p858_p11 = pnand %p856_p10, %p853_p9 }
 0x2f2   :  { %861 = shalt.err (!%p858_p11)
}
 0x2f3   :  { %591 = dma.vmem_to_hbm [thread:$0]  %s589_s30, 128, %s1002_s7, [#allocation4]  }
 0x2f4   :  { %868 = dma.done.wait [#allocation4], 128  }
 0x2f5   :  { %869 = vsyncadd [#allocation4], 4294967168 }
 0x2f6   :  { %595 = vsyncpa [#allocation3], 1 }
 0x2f7   :  { %596 = vsyncpa [#allocation6], 1 }
 0x2f8   :  { %597 = vsyncpa [#allocation9], 1 }
 0x2f9   :  { %598 = vsyncpa [#allocation4], 1 }

</bundles_post_ra>
